<compile_context>
chip_gen: v5e
topology: v5e:2x2
jax: 0.10.0
libtpu: 0.0.40
codegen_flags: <defaults>
</compile_context>

<pallas_src>
import jax
import jax.numpy as jnp
from jax import lax
from jax.experimental import pallas as pl
from jax.experimental.pallas import tpu as pltpu


def _packed_offsets(H):
    """Sublane offsets (8-aligned where it matters) inside the packed param array."""
    off_whh = 0
    off_bias = H
    off_whead = ((H + 1 + 7) // 8) * 8   # align W_head rows to an 8-sublane boundary
    off_bhead = off_whead + H
    rows = off_bhead + 1
    return off_whh, off_bias, off_whead, off_bhead, rows


def lstm_fused_kernel(x_ref, wih_ref, pk_ref, out_ref):
    """x_ref:   (T, D)   last batch row of the input sequence, f32
       wih_ref: (D, 4H)  W_ih^T
       pk_ref:  (R, 4H)  packed small params:
                  rows [0, H)                : W_hh^T
                  row  H                     : b_ih + b_hh
                  rows [off_whead, off_whead+H): W_head = fc1_w^T @ fc2_w^T (lane-padded)
                  row  off_bhead             : b_head = fc1_b @ fc2_w^T + fc2_b (lane-padded)
       out_ref: (T, 2)   ReLU(fc head) of the last batch element's hidden states."""
    T, D = x_ref.shape
    H4 = wih_ref.shape[1]
    H = H4 // 4
    off_whh, off_bias, off_whead, off_bhead, _ = _packed_offsets(H)

    whh = pk_ref[off_whh:off_whh + H, :]                  # (H, 4H)
    bias = pk_ref[off_bias:off_bias + 1, :]               # (1, 4H)
    w_head = pk_ref[off_whead:off_whead + H, 0:2]         # (H, 2)
    b_head = pk_ref[off_bhead:off_bhead + 1, 0:2]         # (1, 2)

    # Fused input projection with bias folded in: one MXU matmul, done once.
    gx = jnp.dot(x_ref[...], wih_ref[...],
                 preferred_element_type=jnp.float32) + bias          # (T, 4H)

    # Full-vreg activation mask: tanh on the g-gate lanes [2H,3H), sigmoid elsewhere.
    lane = lax.broadcasted_iota(jnp.int32, (1, H4), 1)
    g_lanes = (lane >= 2 * H) & (lane < 3 * H)

    h = jnp.zeros((1, H), jnp.float32)
    c = jnp.zeros((1, H), jnp.float32)
    h_rows = []
    for t in range(T):  # T static & tiny -> full unroll; h/c/history live in vregs
        gates = gx[t:t + 1, :] + jnp.dot(h, whh,
                                         preferred_element_type=jnp.float32)  # (1, 4H)
        act = jnp.where(g_lanes, jnp.tanh(gates), jax.nn.sigmoid(gates))
        i_g = act[:, 0 * H:1 * H]
        f_g = act[:, 1 * H:2 * H]
        g_g = act[:, 2 * H:3 * H]
        o_g = act[:, 3 * H:4 * H]
        c = f_g * c + i_g * g_g
        h = o_g * jnp.tanh(c)
        h_rows.append(h)

    h_all = jnp.concatenate(h_rows, axis=0)                           # (T, H)
    y = jnp.dot(h_all, w_head, preferred_element_type=jnp.float32) + b_head
    out_ref[...] = jnp.maximum(y, 0.0).astype(out_ref.dtype)


def lstm_forward(x, params):
    """x: (B, T, 300) float32, batch-first as in PyTorch. Returns (T, 2), matching
    `x = self.fc(lstm_out); return x[:][-1][:]` (FC outputs of the last batch element)."""
    B, T, D = x.shape
    H = params["hidden"]
    H4 = 4 * H

    x_last = x[B - 1].astype(jnp.float32)                   # (T, D) only row the head reads
    wih_t = params["w_ih"].T.astype(jnp.float32)            # (D, 4H)
    whh_t = params["w_hh"].T.astype(jnp.float32)            # (H, 4H)
    bias = (params["b_ih"] + params["b_hh"]).reshape(1, H4)  # (1, 4H)

    # Collapse the head: Dropout (eval) is identity; two affine layers compose exactly.
    w_head = params["fc1_w"].T @ params["fc2_w"].T                               # (H, 2)
    b_head = (params["fc1_b"] @ params["fc2_w"].T + params["fc2_b"]).reshape(1, 2)

    off_whh, off_bias, off_whead, off_bhead, rows = _packed_offsets(H)
    pad_lanes = lambda a: jnp.pad(a, ((0, 0), (0, H4 - a.shape[1])))
    packed = jnp.concatenate([
        whh_t,                                                 # rows [0, H)
        bias,                                                  # row  H
        jnp.zeros((off_whead - (H + 1), H4), jnp.float32),     # alignment padding
        pad_lanes(w_head),                                     # rows [off_whead, off_whead+H)
        pad_lanes(b_head),                                     # row  off_bhead
    ], axis=0).astype(jnp.float32)                             # (rows, 4H)

    vmem = pl.BlockSpec(memory_space=pltpu.MemorySpace.VMEM)
    out = pl.pallas_call(
        lstm_fused_kernel,
        out_shape=jax.ShapeDtypeStruct((T, 2), jnp.float32),
        in_specs=[vmem, vmem, vmem],
        out_specs=vmem,
    )(x_last, wih_t, packed)
    return out  # (T, 2)


def reference_forward(x, params):
    """Pure-JAX reference of the PyTorch forward (eval-mode dropout)."""
    B, T, D = x.shape
    H = params["hidden"]
    w_ih, w_hh = params["w_ih"], params["w_hh"]
    b = params["b_ih"] + params["b_hh"]

    def cell(carry, x_t):
        h, c = carry
        gates = x_t @ w_ih.T + h @ w_hh.T + b
        i = jax.nn.sigmoid(gates[:, 0 * H:1 * H])
        f = jax.nn.sigmoid(gates[:, 1 * H:2 * H])
        g = jnp.tanh(gates[:, 2 * H:3 * H])
        o = jax.nn.sigmoid(gates[:, 3 * H:4 * H])
        c_new = f * c + i * g
        h_new = o * jnp.tanh(c_new)
        return (h_new, c_new), h_new

    h0 = jnp.zeros((B, H), jnp.float32)
    c0 = jnp.zeros((B, H), jnp.float32)
    _, hs = lax.scan(cell, (h0, c0), jnp.transpose(x, (1, 0, 2)))  # (T, B, H)
    hs = jnp.transpose(hs, (1, 0, 2))                              # (B, T, H)
    y = hs @ params["fc1_w"].T + params["fc1_b"]
    y = y @ params["fc2_w"].T + params["fc2_b"]
    y = jnp.maximum(y, 0.0)
    return y[-1]                                                   # (T, 2)


def init_params(hidden, input_size=300, key=jax.random.PRNGKey(0)):
    ks = jax.random.split(key, 8)
    s_lstm = 1.0 / jnp.sqrt(hidden)
    s_fc1 = 1.0 / jnp.sqrt(hidden)
    s_fc2 = 1.0 / jnp.sqrt(32.0)
    u = lambda k, shape, s: jax.random.uniform(k, shape, jnp.float32, -s, s)
    return {
        "hidden": hidden,
        "w_ih": u(ks[0], (4 * hidden, input_size), s_lstm),
        "w_hh": u(ks[1], (4 * hidden, hidden), s_lstm),
        "b_ih": u(ks[2], (4 * hidden,), s_lstm),
        "b_hh": u(ks[3], (4 * hidden,), s_lstm),
        "fc1_w": u(ks[4], (32, hidden), s_fc1),
        "fc1_b": u(ks[5], (32,), s_fc1),
        "fc2_w": u(ks[6], (2, 32), s_fc2),
        "fc2_b": u(ks[7], (2,), s_fc2),
    }


if __name__ == "__main__":
    B, T, D, H = 2, 8, 300, 32
    key = jax.random.PRNGKey(0)
    k_x, k_p = jax.random.split(key)
    x = jax.random.normal(k_x, (B, T, D), jnp.float32)
    params = init_params(H, D, k_p)

    out = jax.block_until_ready(lstm_forward(x, params))
    ref = jax.block_until_ready(reference_forward(x, params))

    assert out.shape == (T, 2), out.shape
    assert jnp.allclose(out, ref, atol=1e-4, rtol=1e-4), float(jnp.max(jnp.abs(out - ref)))
    print("KERNEL_OK")
</pallas_src>

<mosaic_0001>
module attributes {stable_mosaic.version = 11 : i64} {
  func.func @lstm_fused_kernel(%arg0: memref<8x300xf32, #tpu.memory_space<vmem>>, %arg1: memref<300x128xf32, #tpu.memory_space<vmem>>, %arg2: memref<73x128xf32, #tpu.memory_space<vmem>>, %arg3: memref<8x2xf32, #tpu.memory_space<vmem>>) attributes {dimension_semantics = [], scalar_prefetch = 0 : i64, scratch_operands = 0 : i64, tpu.core_type = #tpu.core_type<tc>} {
    %c0 = arith.constant 0 : index
    %c0_0 = arith.constant 0 : index
    %0 = vector.load %arg2[%c0, %c0_0] : memref<73x128xf32, #tpu.memory_space<vmem>>, vector<32x128xf32>
    %c32 = arith.constant 32 : index
    %c0_1 = arith.constant 0 : index
    %1 = vector.load %arg2[%c32, %c0_1] : memref<73x128xf32, #tpu.memory_space<vmem>>, vector<1x128xf32>
    %c40 = arith.constant 40 : index
    %c0_2 = arith.constant 0 : index
    %2 = vector.load %arg2[%c40, %c0_2] : memref<73x128xf32, #tpu.memory_space<vmem>>, vector<32x2xf32>
    %c72 = arith.constant 72 : index
    %c0_3 = arith.constant 0 : index
    %3 = vector.load %arg2[%c72, %c0_3] : memref<73x128xf32, #tpu.memory_space<vmem>>, vector<1x2xf32>
    %c0_4 = arith.constant 0 : index
    %c0_5 = arith.constant 0 : index
    %4 = vector.load %arg0[%c0_4, %c0_5] : memref<8x300xf32, #tpu.memory_space<vmem>>, vector<8x300xf32>
    %c0_6 = arith.constant 0 : index
    %c0_7 = arith.constant 0 : index
    %5 = vector.load %arg1[%c0_6, %c0_7] : memref<300x128xf32, #tpu.memory_space<vmem>>, vector<300x128xf32>
    %cst = arith.constant dense<0.000000e+00> : vector<8x128xf32>
    %6 = tpu.matmul %4, %5, %cst {dimension_numbers = #tpu.dot_dimension_numbers<[1], [0], [0], [1], [0, 0, 1, 1], [], []>} : vector<8x300xf32>, vector<300x128xf32>, vector<8x128xf32> -> vector<8x128xf32>
    %7 = vector.broadcast %1 : vector<1x128xf32> to vector<8x128xf32>
    %8 = arith.addf %6, %7 : vector<8x128xf32>
    %9 = tpu.iota {dimensions = array<i32: 1>} : vector<1x128xi32>
    %c64_i32 = arith.constant 64 : i32
    %10 = vector.broadcast %c64_i32 : i32 to vector<1x128xi32>
    %11 = arith.cmpi sge, %9, %10 : vector<1x128xi32>
    %c96_i32 = arith.constant 96 : i32
    %12 = vector.broadcast %c96_i32 : i32 to vector<1x128xi32>
    %13 = arith.cmpi slt, %9, %12 : vector<1x128xi32>
    %14 = arith.andi %11, %13 : vector<1x128xi1>
    %cst_8 = arith.constant 0.000000e+00 : f32
    %15 = vector.broadcast %cst_8 : f32 to vector<1x32xf32>
    %cst_9 = arith.constant 0.000000e+00 : f32
    %16 = vector.broadcast %cst_9 : f32 to vector<1x32xf32>
    %17 = vector.extract_strided_slice %8 {offsets = [0, 0], sizes = [1, 128], strides = [1, 1]} : vector<8x128xf32> to vector<1x128xf32>
    %cst_10 = arith.constant dense<0.000000e+00> : vector<1x128xf32>
    %18 = tpu.matmul %15, %0, %cst_10 {dimension_numbers = #tpu.dot_dimension_numbers<[1], [0], [0], [1], [0, 0, 1, 1], [], []>} : vector<1x32xf32>, vector<32x128xf32>, vector<1x128xf32> -> vector<1x128xf32>
    %19 = arith.addf %17, %18 : vector<1x128xf32>
    %20 = math.tanh %19 : vector<1x128xf32>
    %21 = arith.negf %19 : vector<1x128xf32>
    %22 = math.exp %21 : vector<1x128xf32>
    %cst_11 = arith.constant 1.000000e+00 : f32
    %23 = vector.broadcast %cst_11 : f32 to vector<1x128xf32>
    %24 = arith.addf %23, %22 : vector<1x128xf32>
    %25 = arith.divf %23, %24 : vector<1x128xf32>
    %26 = arith.select %14, %20, %25 : vector<1x128xi1>, vector<1x128xf32>
    %27 = vector.extract_strided_slice %26 {offsets = [0, 0], sizes = [1, 32], strides = [1, 1]} : vector<1x128xf32> to vector<1x32xf32>
    %28 = vector.extract_strided_slice %26 {offsets = [0, 32], sizes = [1, 32], strides = [1, 1]} : vector<1x128xf32> to vector<1x32xf32>
    %29 = vector.extract_strided_slice %26 {offsets = [0, 64], sizes = [1, 32], strides = [1, 1]} : vector<1x128xf32> to vector<1x32xf32>
    %30 = vector.extract_strided_slice %26 {offsets = [0, 96], sizes = [1, 32], strides = [1, 1]} : vector<1x128xf32> to vector<1x32xf32>
    %31 = arith.mulf %28, %16 : vector<1x32xf32>
    %32 = arith.mulf %27, %29 : vector<1x32xf32>
    %33 = arith.addf %31, %32 : vector<1x32xf32>
    %34 = math.tanh %33 : vector<1x32xf32>
    %35 = arith.mulf %30, %34 : vector<1x32xf32>
    %36 = vector.extract_strided_slice %8 {offsets = [1, 0], sizes = [1, 128], strides = [1, 1]} : vector<8x128xf32> to vector<1x128xf32>
    %cst_12 = arith.constant dense<0.000000e+00> : vector<1x128xf32>
    %37 = tpu.matmul %35, %0, %cst_12 {dimension_numbers = #tpu.dot_dimension_numbers<[1], [0], [0], [1], [0, 0, 1, 1], [], []>} : vector<1x32xf32>, vector<32x128xf32>, vector<1x128xf32> -> vector<1x128xf32>
    %38 = arith.addf %36, %37 : vector<1x128xf32>
    %39 = math.tanh %38 : vector<1x128xf32>
    %40 = arith.negf %38 : vector<1x128xf32>
    %41 = math.exp %40 : vector<1x128xf32>
    %cst_13 = arith.constant 1.000000e+00 : f32
    %42 = vector.broadcast %cst_13 : f32 to vector<1x128xf32>
    %43 = arith.addf %42, %41 : vector<1x128xf32>
    %44 = arith.divf %42, %43 : vector<1x128xf32>
    %45 = arith.select %14, %39, %44 : vector<1x128xi1>, vector<1x128xf32>
    %46 = vector.extract_strided_slice %45 {offsets = [0, 0], sizes = [1, 32], strides = [1, 1]} : vector<1x128xf32> to vector<1x32xf32>
    %47 = vector.extract_strided_slice %45 {offsets = [0, 32], sizes = [1, 32], strides = [1, 1]} : vector<1x128xf32> to vector<1x32xf32>
    %48 = vector.extract_strided_slice %45 {offsets = [0, 64], sizes = [1, 32], strides = [1, 1]} : vector<1x128xf32> to vector<1x32xf32>
    %49 = vector.extract_strided_slice %45 {offsets = [0, 96], sizes = [1, 32], strides = [1, 1]} : vector<1x128xf32> to vector<1x32xf32>
    %50 = arith.mulf %47, %33 : vector<1x32xf32>
    %51 = arith.mulf %46, %48 : vector<1x32xf32>
    %52 = arith.addf %50, %51 : vector<1x32xf32>
    %53 = math.tanh %52 : vector<1x32xf32>
    %54 = arith.mulf %49, %53 : vector<1x32xf32>
    %55 = vector.extract_strided_slice %8 {offsets = [2, 0], sizes = [1, 128], strides = [1, 1]} : vector<8x128xf32> to vector<1x128xf32>
    %cst_14 = arith.constant dense<0.000000e+00> : vector<1x128xf32>
    %56 = tpu.matmul %54, %0, %cst_14 {dimension_numbers = #tpu.dot_dimension_numbers<[1], [0], [0], [1], [0, 0, 1, 1], [], []>} : vector<1x32xf32>, vector<32x128xf32>, vector<1x128xf32> -> vector<1x128xf32>
    %57 = arith.addf %55, %56 : vector<1x128xf32>
    %58 = math.tanh %57 : vector<1x128xf32>
    %59 = arith.negf %57 : vector<1x128xf32>
    %60 = math.exp %59 : vector<1x128xf32>
    %cst_15 = arith.constant 1.000000e+00 : f32
    %61 = vector.broadcast %cst_15 : f32 to vector<1x128xf32>
    %62 = arith.addf %61, %60 : vector<1x128xf32>
    %63 = arith.divf %61, %62 : vector<1x128xf32>
    %64 = arith.select %14, %58, %63 : vector<1x128xi1>, vector<1x128xf32>
    %65 = vector.extract_strided_slice %64 {offsets = [0, 0], sizes = [1, 32], strides = [1, 1]} : vector<1x128xf32> to vector<1x32xf32>
    %66 = vector.extract_strided_slice %64 {offsets = [0, 32], sizes = [1, 32], strides = [1, 1]} : vector<1x128xf32> to vector<1x32xf32>
    %67 = vector.extract_strided_slice %64 {offsets = [0, 64], sizes = [1, 32], strides = [1, 1]} : vector<1x128xf32> to vector<1x32xf32>
    %68 = vector.extract_strided_slice %64 {offsets = [0, 96], sizes = [1, 32], strides = [1, 1]} : vector<1x128xf32> to vector<1x32xf32>
    %69 = arith.mulf %66, %52 : vector<1x32xf32>
    %70 = arith.mulf %65, %67 : vector<1x32xf32>
    %71 = arith.addf %69, %70 : vector<1x32xf32>
    %72 = math.tanh %71 : vector<1x32xf32>
    %73 = arith.mulf %68, %72 : vector<1x32xf32>
    %74 = vector.extract_strided_slice %8 {offsets = [3, 0], sizes = [1, 128], strides = [1, 1]} : vector<8x128xf32> to vector<1x128xf32>
    %cst_16 = arith.constant dense<0.000000e+00> : vector<1x128xf32>
    %75 = tpu.matmul %73, %0, %cst_16 {dimension_numbers = #tpu.dot_dimension_numbers<[1], [0], [0], [1], [0, 0, 1, 1], [], []>} : vector<1x32xf32>, vector<32x128xf32>, vector<1x128xf32> -> vector<1x128xf32>
    %76 = arith.addf %74, %75 : vector<1x128xf32>
    %77 = math.tanh %76 : vector<1x128xf32>
    %78 = arith.negf %76 : vector<1x128xf32>
    %79 = math.exp %78 : vector<1x128xf32>
    %cst_17 = arith.constant 1.000000e+00 : f32
    %80 = vector.broadcast %cst_17 : f32 to vector<1x128xf32>
    %81 = arith.addf %80, %79 : vector<1x128xf32>
    %82 = arith.divf %80, %81 : vector<1x128xf32>
    %83 = arith.select %14, %77, %82 : vector<1x128xi1>, vector<1x128xf32>
    %84 = vector.extract_strided_slice %83 {offsets = [0, 0], sizes = [1, 32], strides = [1, 1]} : vector<1x128xf32> to vector<1x32xf32>
    %85 = vector.extract_strided_slice %83 {offsets = [0, 32], sizes = [1, 32], strides = [1, 1]} : vector<1x128xf32> to vector<1x32xf32>
    %86 = vector.extract_strided_slice %83 {offsets = [0, 64], sizes = [1, 32], strides = [1, 1]} : vector<1x128xf32> to vector<1x32xf32>
    %87 = vector.extract_strided_slice %83 {offsets = [0, 96], sizes = [1, 32], strides = [1, 1]} : vector<1x128xf32> to vector<1x32xf32>
    %88 = arith.mulf %85, %71 : vector<1x32xf32>
    %89 = arith.mulf %84, %86 : vector<1x32xf32>
    %90 = arith.addf %88, %89 : vector<1x32xf32>
    %91 = math.tanh %90 : vector<1x32xf32>
    %92 = arith.mulf %87, %91 : vector<1x32xf32>
    %93 = vector.extract_strided_slice %8 {offsets = [4, 0], sizes = [1, 128], strides = [1, 1]} : vector<8x128xf32> to vector<1x128xf32>
    %cst_18 = arith.constant dense<0.000000e+00> : vector<1x128xf32>
    %94 = tpu.matmul %92, %0, %cst_18 {dimension_numbers = #tpu.dot_dimension_numbers<[1], [0], [0], [1], [0, 0, 1, 1], [], []>} : vector<1x32xf32>, vector<32x128xf32>, vector<1x128xf32> -> vector<1x128xf32>
    %95 = arith.addf %93, %94 : vector<1x128xf32>
    %96 = math.tanh %95 : vector<1x128xf32>
    %97 = arith.negf %95 : vector<1x128xf32>
    %98 = math.exp %97 : vector<1x128xf32>
    %cst_19 = arith.constant 1.000000e+00 : f32
    %99 = vector.broadcast %cst_19 : f32 to vector<1x128xf32>
    %100 = arith.addf %99, %98 : vector<1x128xf32>
    %101 = arith.divf %99, %100 : vector<1x128xf32>
    %102 = arith.select %14, %96, %101 : vector<1x128xi1>, vector<1x128xf32>
    %103 = vector.extract_strided_slice %102 {offsets = [0, 0], sizes = [1, 32], strides = [1, 1]} : vector<1x128xf32> to vector<1x32xf32>
    %104 = vector.extract_strided_slice %102 {offsets = [0, 32], sizes = [1, 32], strides = [1, 1]} : vector<1x128xf32> to vector<1x32xf32>
    %105 = vector.extract_strided_slice %102 {offsets = [0, 64], sizes = [1, 32], strides = [1, 1]} : vector<1x128xf32> to vector<1x32xf32>
    %106 = vector.extract_strided_slice %102 {offsets = [0, 96], sizes = [1, 32], strides = [1, 1]} : vector<1x128xf32> to vector<1x32xf32>
    %107 = arith.mulf %104, %90 : vector<1x32xf32>
    %108 = arith.mulf %103, %105 : vector<1x32xf32>
    %109 = arith.addf %107, %108 : vector<1x32xf32>
    %110 = math.tanh %109 : vector<1x32xf32>
    %111 = arith.mulf %106, %110 : vector<1x32xf32>
    %112 = vector.extract_strided_slice %8 {offsets = [5, 0], sizes = [1, 128], strides = [1, 1]} : vector<8x128xf32> to vector<1x128xf32>
    %cst_20 = arith.constant dense<0.000000e+00> : vector<1x128xf32>
    %113 = tpu.matmul %111, %0, %cst_20 {dimension_numbers = #tpu.dot_dimension_numbers<[1], [0], [0], [1], [0, 0, 1, 1], [], []>} : vector<1x32xf32>, vector<32x128xf32>, vector<1x128xf32> -> vector<1x128xf32>
    %114 = arith.addf %112, %113 : vector<1x128xf32>
    %115 = math.tanh %114 : vector<1x128xf32>
    %116 = arith.negf %114 : vector<1x128xf32>
    %117 = math.exp %116 : vector<1x128xf32>
    %cst_21 = arith.constant 1.000000e+00 : f32
    %118 = vector.broadcast %cst_21 : f32 to vector<1x128xf32>
    %119 = arith.addf %118, %117 : vector<1x128xf32>
    %120 = arith.divf %118, %119 : vector<1x128xf32>
    %121 = arith.select %14, %115, %120 : vector<1x128xi1>, vector<1x128xf32>
    %122 = vector.extract_strided_slice %121 {offsets = [0, 0], sizes = [1, 32], strides = [1, 1]} : vector<1x128xf32> to vector<1x32xf32>
    %123 = vector.extract_strided_slice %121 {offsets = [0, 32], sizes = [1, 32], strides = [1, 1]} : vector<1x128xf32> to vector<1x32xf32>
    %124 = vector.extract_strided_slice %121 {offsets = [0, 64], sizes = [1, 32], strides = [1, 1]} : vector<1x128xf32> to vector<1x32xf32>
    %125 = vector.extract_strided_slice %121 {offsets = [0, 96], sizes = [1, 32], strides = [1, 1]} : vector<1x128xf32> to vector<1x32xf32>
    %126 = arith.mulf %123, %109 : vector<1x32xf32>
    %127 = arith.mulf %122, %124 : vector<1x32xf32>
    %128 = arith.addf %126, %127 : vector<1x32xf32>
    %129 = math.tanh %128 : vector<1x32xf32>
    %130 = arith.mulf %125, %129 : vector<1x32xf32>
    %131 = vector.extract_strided_slice %8 {offsets = [6, 0], sizes = [1, 128], strides = [1, 1]} : vector<8x128xf32> to vector<1x128xf32>
    %cst_22 = arith.constant dense<0.000000e+00> : vector<1x128xf32>
    %132 = tpu.matmul %130, %0, %cst_22 {dimension_numbers = #tpu.dot_dimension_numbers<[1], [0], [0], [1], [0, 0, 1, 1], [], []>} : vector<1x32xf32>, vector<32x128xf32>, vector<1x128xf32> -> vector<1x128xf32>
    %133 = arith.addf %131, %132 : vector<1x128xf32>
    %134 = math.tanh %133 : vector<1x128xf32>
    %135 = arith.negf %133 : vector<1x128xf32>
    %136 = math.exp %135 : vector<1x128xf32>
    %cst_23 = arith.constant 1.000000e+00 : f32
    %137 = vector.broadcast %cst_23 : f32 to vector<1x128xf32>
    %138 = arith.addf %137, %136 : vector<1x128xf32>
    %139 = arith.divf %137, %138 : vector<1x128xf32>
    %140 = arith.select %14, %134, %139 : vector<1x128xi1>, vector<1x128xf32>
    %141 = vector.extract_strided_slice %140 {offsets = [0, 0], sizes = [1, 32], strides = [1, 1]} : vector<1x128xf32> to vector<1x32xf32>
    %142 = vector.extract_strided_slice %140 {offsets = [0, 32], sizes = [1, 32], strides = [1, 1]} : vector<1x128xf32> to vector<1x32xf32>
    %143 = vector.extract_strided_slice %140 {offsets = [0, 64], sizes = [1, 32], strides = [1, 1]} : vector<1x128xf32> to vector<1x32xf32>
    %144 = vector.extract_strided_slice %140 {offsets = [0, 96], sizes = [1, 32], strides = [1, 1]} : vector<1x128xf32> to vector<1x32xf32>
    %145 = arith.mulf %142, %128 : vector<1x32xf32>
    %146 = arith.mulf %141, %143 : vector<1x32xf32>
    %147 = arith.addf %145, %146 : vector<1x32xf32>
    %148 = math.tanh %147 : vector<1x32xf32>
    %149 = arith.mulf %144, %148 : vector<1x32xf32>
    %150 = vector.extract_strided_slice %8 {offsets = [7, 0], sizes = [1, 128], strides = [1, 1]} : vector<8x128xf32> to vector<1x128xf32>
    %cst_24 = arith.constant dense<0.000000e+00> : vector<1x128xf32>
    %151 = tpu.matmul %149, %0, %cst_24 {dimension_numbers = #tpu.dot_dimension_numbers<[1], [0], [0], [1], [0, 0, 1, 1], [], []>} : vector<1x32xf32>, vector<32x128xf32>, vector<1x128xf32> -> vector<1x128xf32>
    %152 = arith.addf %150, %151 : vector<1x128xf32>
    %153 = math.tanh %152 : vector<1x128xf32>
    %154 = arith.negf %152 : vector<1x128xf32>
    %155 = math.exp %154 : vector<1x128xf32>
    %cst_25 = arith.constant 1.000000e+00 : f32
    %156 = vector.broadcast %cst_25 : f32 to vector<1x128xf32>
    %157 = arith.addf %156, %155 : vector<1x128xf32>
    %158 = arith.divf %156, %157 : vector<1x128xf32>
    %159 = arith.select %14, %153, %158 : vector<1x128xi1>, vector<1x128xf32>
    %160 = vector.extract_strided_slice %159 {offsets = [0, 0], sizes = [1, 32], strides = [1, 1]} : vector<1x128xf32> to vector<1x32xf32>
    %161 = vector.extract_strided_slice %159 {offsets = [0, 32], sizes = [1, 32], strides = [1, 1]} : vector<1x128xf32> to vector<1x32xf32>
    %162 = vector.extract_strided_slice %159 {offsets = [0, 64], sizes = [1, 32], strides = [1, 1]} : vector<1x128xf32> to vector<1x32xf32>
    %163 = vector.extract_strided_slice %159 {offsets = [0, 96], sizes = [1, 32], strides = [1, 1]} : vector<1x128xf32> to vector<1x32xf32>
    %164 = arith.mulf %161, %147 : vector<1x32xf32>
    %165 = arith.mulf %160, %162 : vector<1x32xf32>
    %166 = arith.addf %164, %165 : vector<1x32xf32>
    %167 = math.tanh %166 : vector<1x32xf32>
    %168 = arith.mulf %163, %167 : vector<1x32xf32>
    %169 = tpu.concatenate %35, %54, %73, %92, %111, %130, %149, %168 in 0 : vector<1x32xf32>, vector<1x32xf32>, vector<1x32xf32>, vector<1x32xf32>, vector<1x32xf32>, vector<1x32xf32>, vector<1x32xf32>, vector<1x32xf32> -> vector<8x32xf32>
    %cst_26 = arith.constant dense<0.000000e+00> : vector<8x2xf32>
    %170 = tpu.matmul %169, %2, %cst_26 {dimension_numbers = #tpu.dot_dimension_numbers<[1], [0], [0], [1], [0, 0, 1, 1], [], []>} : vector<8x32xf32>, vector<32x2xf32>, vector<8x2xf32> -> vector<8x2xf32>
    %171 = vector.broadcast %3 : vector<1x2xf32> to vector<8x2xf32>
    %172 = arith.addf %170, %171 : vector<8x2xf32>
    %cst_27 = arith.constant 0.000000e+00 : f32
    %173 = vector.broadcast %cst_27 : f32 to vector<8x2xf32>
    %174 = arith.maximumf %172, %173 : vector<8x2xf32>
    %c0_28 = arith.constant 0 : index
    %c0_29 = arith.constant 0 : index
    %175 = vector.load %arg3[%c0_28, %c0_29] : memref<8x2xf32, #tpu.memory_space<vmem>>, vector<8x2xf32>
    tpu.vector_store %arg3[%c0_28, %c0_29], %174 {strides = array<i32>} : memref<8x2xf32, #tpu.memory_space<vmem>>, vector<8x2xf32>,
    return
  }
}

</mosaic_0001>

<bundles_post_ra>
// kernel: tpu_custom_call.1
= control target key start
LH: loop header
LB: loop body
LE: loop exit
PB: predicated region body
PF: predicated region fallthrough
CT: control target
= control target key end

     0   :  { %8 = vsyncpa [#allocation3], 0  ;;  %s1115_s0 = inlined_call_operand.hbm [shape: f32[8,300], index: 0, kind: input, shape index: {}]   ;;  %s1116_s1 = inlined_call_operand.hbm [shape: f32[300,128], index: 1, kind: input, shape index: {}]   ;;  %s1117_s2 = inlined_call_operand.hbm [shape: f32[73,128], index: 2, kind: input, shape index: {}]   ;;  %s1118_s3 = inlined_call_operand.vmem [shape: f32[8,2], index: 3, kind: output, shape index: {}]  }
   0x1   :  { %9 = vsyncpa [#allocation5], 0  ;;  %s25_s14 = sshll.u32 %s1116_s1, 4  ;;  %s959_s15 = smov [#allocation4]   ;;  %s26_s14 = int_to_ptr.hbm [resolvable:$true] %s25_s14 }
   0x2   :  { %s27_s16 = sshll.u32 %s959_s15, 4  ;;  %s15_s19 = sshll.u32 %s1115_s0, 4  ;;  %s28_s16 = int_to_ptr.vmem [resolvable:$true] %s27_s16  ;;  %s16_s19 = int_to_ptr.hbm [resolvable:$true] %s15_s19 }
   0x3   :  { %s960_s20 = smov 128   ;;  %s961_s21 = smov 8  }
   0x4   :  { %33 = dma.hbm_to_vmem [thread:$0]  %s26_s14, 4864, %s28_s16, [#allocation5], %s960_s20, %s960_s20, %s961_s21  }
   0x5   :  { %s962_s22 = smov [#allocation2]   ;;  %s38_s26 = sshll.u32 %s1117_s2, 4  ;;  %s39_s26 = int_to_ptr.hbm [resolvable:$true] %s38_s26 }
   0x6   :  { %s17_s23 = sshll.u32 %s962_s22, 4  ;;  %s963_s1 = smov [#allocation6]   ;;  %s18_s23 = int_to_ptr.vmem [resolvable:$true] %s17_s23 }
   0x7   :  { %20 = dma.hbm_to_vmem [thread:$0]  %s16_s19, 384, %s18_s23, [#allocation3]  }
   0x8   :  { %s40_s27 = sshll.u32 %s963_s1, 4  ;;  %s41_s27 = int_to_ptr.vmem [resolvable:$true] %s40_s27 }
   0x9   :  { %46 = dma.hbm_to_vmem [thread:$0]  %s39_s26, 1280, %s41_s27, [#allocation5], %s960_s20, %s960_s20, %s961_s21  }
   0xa   :  { %955 = dma.done.wait [#allocation3], 384  }
   0xb   :  { %956 = vsyncadd [#allocation3], 4294966912 }
   0xc   :  { %957 = dma.done.wait [#allocation5], 6144  }
   0xd   :  { %958 = vsyncadd [#allocation5], 4294961152  ;;  %v87_v0 = vld [vmem:[#allocation4 + $0x78] sm:$0xff]  ;;  %v86_v1 = vld [vmem:[#allocation4 + $0x70] sm:$0xff]  ;;  %vm115_vm0 = vcmask 1043456   ;;  %vm111_vm1 = vcmask 359424   ;;  %v179_v58 = vlaneseq }
   0xe   :  { %v103_v2 = vld [vmem:[#allocation4 + $0xf8] sm:$0xff]  ;;  %119 = vmatpush.msra.mxu0 %v87_v0  ;;  %v102_v3 = vld [vmem:[#allocation4 + $0xf0] sm:$0xff]  ;;  %v85_v4 = vld [vmem:[#allocation4 + $0x68] sm:$0xff]  ;;  %v964_v33 = vmov 0.0   ;;  %s965_s0 = smov 64   ;;  %s966_s2 = smov 32  }
   0xf   :  { %139 = vmatpush.msra.mxu1 %v103_v2  ;;  %v101_v5 = vld [vmem:[#allocation4 + $0xe8] sm:$0xff]  ;;  %v84_v6 = vld [vmem:[#allocation4 + $0x60] sm:$0xff]  ;;  %v83_v8 = vld [vmem:[#allocation4 + $0x58] sm:$0xff]  ;;  %v180_v60 = vand.u32 127, %v179_v58  ;;  %vm184_vm9 = vcmask 261120  }
  0x10   :  { %120 = vmatpush.msra.mxu0 %v86_v1  ;;  %v100_v7 = vld [vmem:[#allocation4 + $0xe0] sm:$0xff]  ;;  %v99_v9 = vld [vmem:[#allocation4 + $0xd8] sm:$0xff]  ;;  %v109_v10 = vld [vmem:[#allocation4 + $0x128] sm:$0xf] }
  0x11   :  { %140 = vmatpush.msra.mxu1 %v102_v3  ;;  %v108_v11 = vld [vmem:[#allocation4 + $0x120] sm:$0xff]  ;;  %v82_v12 = vld [vmem:[#allocation4 + $0x50] sm:$0xff]  ;;  %791 = vmatpush.msk.msra.mxu2 %vm115_vm0, %v109_v10  ;;  %v107_v14 = vld [vmem:[#allocation4 + $0x118] sm:$0xff]  ;;  %vm181_vm2 = vcmp.ge.s32.totalorder %v180_v60, 64  ;;  %vm182_vm3 = vcmp.lt.s32.totalorder %v180_v60, 96 }
  0x12   :  { %121 = vmatpush.msra.mxu0 %v85_v4  ;;  %v98_v13 = vld [vmem:[#allocation4 + $0xd0] sm:$0xff]  ;;  %v997_v15 = vld [vmem:[#allocation6 + $0x18] sm:$0xff]  ;;  %v1000_v19 = vld [vmem:[#allocation6 + $0x10] sm:$0xff] }
  0x13   :  { %141 = vmatpush.msra.mxu1 %v101_v5  ;;  %v81_v16 = vld [vmem:[#allocation4 + $0x48] sm:$0xff]  ;;  %170 = vmatpush.msra.mxu2 %v108_v11  ;;  %v106_v18 = vld [vmem:[#allocation4 + $0x110] sm:$0xff]  ;;  %v80_v20 = vld [vmem:[#allocation4 + $0x40] sm:$0xff] }
  0x14   :  { %122 = vmatpush.msra.mxu0 %v84_v6  ;;  %v97_v17 = vld [vmem:[#allocation4 + $0xc8] sm:$0xff]  ;;  %200 = vmatpush.msra.mxu3 %v997_v15  ;;  %v96_v21 = vld [vmem:[#allocation4 + $0xc0] sm:$0xff]  ;;  %v1003_v22 = vld [vmem:[#allocation6 + $0x8] sm:$0xff] }
  0x15   :  { %142 = vmatpush.msra.mxu1 %v100_v7  ;;  %171 = vmatpush.msra.mxu2 %v107_v14  ;;  %v105_v23 = vld [vmem:[#allocation4 + $0x108] sm:$0xff]  ;;  %v1005_v24 = vld [vmem:[#allocation6] sm:$0xff]  ;;  %v79_v25 = vld [vmem:[#allocation4 + $0x38] sm:$0xff] }
  0x16   :  { %123 = vmatpush.msra.mxu0 %v83_v8  ;;  %201 = vmatpush.msra.mxu3 %v1000_v19  ;;  %v95_v26 = vld [vmem:[#allocation4 + $0xb8] sm:$0xff]  ;;  %v104_v27 = vld [vmem:[#allocation4 + $0x100] sm:$0xff]  ;;  %v78_v28 = vld [vmem:[#allocation4 + $0x30] sm:$0xff] }
  0x17   :  { %143 = vmatpush.msra.mxu1 %v99_v9  ;;  %172 = vmatpush.msra.mxu2 %v106_v18  ;;  %v94_v29 = vld [vmem:[#allocation4 + $0xb0] sm:$0xff]  ;;  %v71_v30 = vld [vmem:[#allocation2 + $0x10] sm:$0xff]  ;;  %v77_v31 = vld [vmem:[#allocation4 + $0x28] sm:$0xff] }
  0x18   :  { %124 = vmatpush.msra.mxu0 %v82_v12  ;;  %202 = vmatpush.msra.mxu3 %v1003_v22  ;;  %v93_v32 = vld [vmem:[#allocation4 + $0xa8] sm:$0xff]  ;;  %v76_v34 = vld [vmem:[#allocation4 + $0x20] sm:$0xff]  ;;  %v75_v36 = vld [vmem:[#allocation4 + $0x18] sm:$0xff] }
  0x19   :  { %144 = vmatpush.msra.mxu1 %v98_v13  ;;  %173 = vmatpush.msra.mxu2 %v105_v23  ;;  %v92_v35 = vld [vmem:[#allocation4 + $0xa0] sm:$0xff]  ;;  %v91_v37 = vld [vmem:[#allocation4 + $0x98] sm:$0xff]  ;;  %v74_v38 = vld [vmem:[#allocation4 + $0x10] sm:$0xff] }
  0x1a   :  { %125 = vmatpush.msra.mxu0 %v81_v16  ;;  %203 = vmatpush.msra.mxu3 %v1005_v24  ;;  %v90_v39 = vld [vmem:[#allocation4 + $0x90] sm:$0xff]  ;;  %v73_v40 = vld [vmem:[#allocation4 + $0x8] sm:$0xff]  ;;  %v72_v42 = vld [vmem:[#allocation4] sm:$0xff] }
  0x1b   :  { %145 = vmatpush.msra.mxu1 %v97_v17  ;;  %174 = vmatpush.msra.mxu2 %v104_v27  ;;  %v89_v41 = vld [vmem:[#allocation4 + $0x88] sm:$0xff]  ;;  %v88_v43 = vld [vmem:[#allocation4 + $0x80] sm:$0xff]  ;;  %v70_v45 = vld [vmem:[#allocation2 + $0x8] sm:$0xff] }
  0x1c   :  { %126 = vmatpush.msra.mxu0 %v80_v20  ;;  %204 = vmatmul.f32.vlgmr.msra.gmra.mxu3 %v964_v33  ;;  %v69_v44 = vld [vmem:[#allocation2] sm:$0xff]  ;;  %v817_v46 = vld [vmem:[#allocation6 + $0x20] ss:$0 sm:$0xff]  ;;  %vm1032_vm5 = vmand %vm181_vm2, %vm182_vm3  ;;  %vm743_vm3 = vcmask 1040384  }
  0x1d   :  { %146 = vmatpush.msra.mxu1 %v96_v21  ;;  %792 = vmatmul.msk.f32.vlgmr.msra.gmra.mxu2 %vm111_vm1, %v71_v30  ;;  %v64_v2 = vld [vmem:[#allocation6 + $0x28] sm:$0xff] }
  0x1e   :  { %127 = vmatpush.msra.mxu0 %v79_v25  ;;  %264 = vmatpush.msrb.mxu3 %v997_v15 }
  0x1f   :  { %147 = vmatpush.msra.mxu1 %v95_v26  ;;  %335 = vmatpush.msrb.mxu2 %v997_v15 }
  0x20   :  { %128 = vmatpush.msra.mxu0 %v78_v28  ;;  %265 = vmatpush.msrb.mxu3 %v1000_v19 }
  0x21   :  { %148 = vmatpush.msra.mxu1 %v94_v29  ;;  %336 = vmatpush.msrb.mxu2 %v1000_v19 }
  0x22   :  { %129 = vmatpush.msra.mxu0 %v77_v31  ;;  %266 = vmatpush.msrb.mxu3 %v1003_v22 }
  0x23   :  { %149 = vmatpush.msra.mxu1 %v93_v32  ;;  %337 = vmatpush.msrb.mxu2 %v1003_v22 }
  0x24   :  { %130 = vmatpush.msra.mxu0 %v76_v34  ;;  %267 = vmatpush.msrb.mxu3 %v1005_v24 }
  0x25   :  { %150 = vmatpush.msra.mxu1 %v92_v35  ;;  %338 = vmatpush.msrb.mxu2 %v1005_v24 }
  0x26   :  { %131 = vmatpush.msra.mxu0 %v75_v36  ;;  %406 = vmatpush.msra.mxu3 %v997_v15 }
  0x27   :  { %151 = vmatpush.msra.mxu1 %v91_v37  ;;  %477 = vmatpush.msra.mxu2 %v997_v15 }
  0x28   :  { %132 = vmatpush.msra.mxu0 %v74_v38  ;;  %407 = vmatpush.msra.mxu3 %v1000_v19 }
  0x29   :  { %152 = vmatpush.msra.mxu1 %v90_v39  ;;  %478 = vmatpush.msra.mxu2 %v1000_v19 }
  0x2a   :  { %133 = vmatpush.msra.mxu0 %v73_v40  ;;  %408 = vmatpush.msra.mxu3 %v1003_v22 }
  0x2b   :  { %153 = vmatpush.msra.mxu1 %v89_v41  ;;  %479 = vmatpush.msra.mxu2 %v1003_v22 }
  0x2c   :  { %134 = vmatpush.msra.mxu0 %v72_v42  ;;  %409 = vmatpush.msra.mxu3 %v1005_v24 }
  0x2d   :  { %154 = vmatpush.msra.mxu1 %v88_v43  ;;  %135 = vmatmul.f32.vlgmr.msra.gmra.mxu0 %v69_v44 }
  0x2e   :  { %155 = vmatmul.f32.vlgmr.msra.gmra.mxu1 %v70_v45  ;;  %690 = vmatpush.msrb.mxu0 %v997_v15 }
  0x2f   :  { %480 = vmatpush.msra.mxu2 %v1005_v24 }
  0x30   :  { %691 = vmatpush.msrb.mxu0 %v1000_v19 }
  0x32   :  { %692 = vmatpush.msrb.mxu0 %v1003_v22 }
  0x34   :  { %693 = vmatpush.msrb.mxu0 %v1005_v24 }
  0x9f   :  { %v205_v52 = vpop.f32.mrf.mxu3 }
  0xa0   :  { %v176_v50 = vpop.f32.mrf.mxu2 }
  0xaa   :  { %v136_v47 = vpop.f32.mrf.mxu0 }
  0xab   :  { %v156_v48 = vpop.f32.mrf.mxu1  ;;  %v137_v49 = vadd.f32 %v817_v46, %v136_v47 }
  0xad   :  { %v157_v51 = vadd.f32 %v156_v48, %v137_v49 }
  0xaf   :  { %v1029_v53 = vadd.f32 %v176_v50, %v157_v51 }
  0xb1   :  { %v208_v54 = vadd.f32 %v205_v52, %v1029_v53 }
  0xb3   :  { %v793_v55 = vmul.f32 -1.442695, %v208_v54 }
  0xb5   :  { %819 = vpow2.f32 %v793_v55 }
  0xbb   :  { %v820_v56 = vpop.eup %819 }
  0xbc   :  { %v213_v57 = vadd.f32 1.0, %v820_v56 }
  0xbe   :  { %821 = vrcp.f32 %v213_v57  ;;  %v225_v63 = vand.u32 2147483648, %v213_v57  ;;  %v223_v1 = vand.u32 2147483647, %v213_v57  ;;  %vm219_vm6 = vweird.f32 %v213_v57 }
  0xbf   :  { %823 = vtanh.f32 %v208_v54 }
  0xc0   :  { %v226_v4 = vor.u32 1.1754944e-38, %v225_v63  ;;  %vm224_vm8 = vcmp.eq.f32.partialorder %v223_v1, 8.507059e+37 }
  0xc4   :  { %v822_v59 = vpop.eup %821 }
  0xc5   :  { %v215_v61 = vmul.f32 %v822_v59, %v213_v57  ;;  %vm220_vm4 = vweird.f32 %v822_v59  ;;  %v824_v6 = vpop.eup %823 }
  0xc6   :  { %vm221_vm7 = vmor %vm219_vm6, %vm220_vm4  ;;  %vm745_vm4 = vcmask 1041408  }
  0xc7   :  { %v216_v62 = vsub.f32 1.0, %v215_v61 }
  0xc9   :  { %v217_v0 = vmul.f32 %v822_v59, %v216_v62 }
  0xcb   :  { %v218_v3 = vadd.f32 %v822_v59, %v217_v0 }
  0xcd   :  { %v222_v5 = vsel %vm221_vm7, %v822_v59, %v218_v3 }
  0xce   :  { %v227_v7 = vsel %vm224_vm8, %v226_v4, %v222_v5 }
  0xcf   :  { %v229_v8 = vsel %vm1032_vm5, %v824_v6, %v227_v7 }
  0xd0   :  { %232 = vrot.lane.b32.xlu0 %v229_v8, %s965_s0  ;;  %v230_v11 = vmul.f32 0.0, %v229_v8 }
 0x142   :  { %v233_v9 = vpop.permute.xlu0 %232 }
 0x143   :  { %v235_v10 = vmul.f32 %v233_v9, %v229_v8 }
 0x145   :  { %237 = vrot.lane.b32.xlu0 %v235_v10, %s966_s2 }
 0x1b7   :  { %v238_v12 = vpop.permute.xlu0 %237 }
 0x1b8   :  { %v240_v13 = vadd.f32 %v238_v12, %v230_v11 }
 0x1ba   :  { %825 = vtanh.f32 %v240_v13  ;;  %v298_v42 = vrot.slane %v240_v13, 7 }
 0x1c0   :  { %v826_v14 = vpop.eup %825 }
 0x1c1   :  { %243 = vrot.lane.b32.xlu1 %v826_v14, %s965_s0 }
 0x233   :  { %v244_v16 = vpop.permute.xlu1 %243 }
 0x234   :  { %v1041_v17 = vmul.f32 %v244_v16, %v229_v8 }
 0x236   :  { %248 = vrot.lane.b32.xlu1 %v1041_v17, %s966_s2 }
 0x2a8   :  { %v249_v18 = vpop.permute.xlu1 %248 }
 0x2a9   :  { %794 = vmatmul.msk.f32.vlgmr.msrb.gmra.mxu3 %vm184_vm9, %v249_v18 }
 0x2aa   :  { %548 = vmatpush.msrb.mxu3 %v997_v15 }
 0x2ac   :  { %549 = vmatpush.msrb.mxu3 %v1000_v19 }
 0x2ae   :  { %550 = vmatpush.msrb.mxu3 %v1003_v22 }
 0x2b0   :  { %551 = vmatpush.msrb.mxu3 %v1005_v24 }
 0x32c   :  { %v269_v20 = vpop.f32.mrf.mxu3 }
 0x32d   :  { %v273_v21 = vrot.slane %v269_v20, 7 }
 0x32f   :  { %v275_v23 = vadd.f32 %v273_v21, %v1029_v53 }
 0x331   :  { %v795_v25 = vmul.f32 -1.442695, %v275_v23 }
 0x333   :  { %827 = vpow2.f32 %v795_v25 }
 0x339   :  { %v828_v26 = vpop.eup %827 }
 0x33a   :  { %v280_v27 = vadd.f32 1.0, %v828_v26 }
 0x33c   :  { %829 = vrcp.f32 %v280_v27  ;;  %v292_v31 = vand.u32 2147483648, %v280_v27  ;;  %v290_v33 = vand.u32 2147483647, %v280_v27  ;;  %vm286_vm11 = vweird.f32 %v280_v27 }
 0x33d   :  { %831 = vtanh.f32 %v275_v23 }
 0x33e   :  { %v293_v35 = vor.u32 1.1754944e-38, %v292_v31  ;;  %vm291_vm13 = vcmp.eq.f32.partialorder %v290_v33, 8.507059e+37 }
 0x342   :  { %v830_v28 = vpop.eup %829 }
 0x343   :  { %v282_v29 = vmul.f32 %v830_v28, %v280_v27  ;;  %vm287_vm10 = vweird.f32 %v830_v28  ;;  %v832_v37 = vpop.eup %831 }
 0x344   :  { %vm288_vm12 = vmor %vm286_vm11, %vm287_vm10  ;;  %vm747_vm11 = vcmask 1042432  }
 0x345   :  { %v283_v30 = vsub.f32 1.0, %v282_v29 }
 0x347   :  { %v284_v32 = vmul.f32 %v830_v28, %v283_v30 }
 0x349   :  { %v285_v34 = vadd.f32 %v830_v28, %v284_v32 }
 0x34b   :  { %v289_v36 = vsel %vm288_vm12, %v830_v28, %v285_v34 }
 0x34c   :  { %v294_v38 = vsel %vm291_vm13, %v293_v35, %v289_v36 }
 0x34d   :  { %v296_v39 = vsel %vm1032_vm5, %v832_v37, %v294_v38 }
 0x34e   :  { %302 = vrot.lane.b32.xlu2 %v296_v39, %s965_s0  ;;  %v300_v43 = vmul.f32 %v298_v42, %v296_v39 }
 0x3a8   :  { %v303_v40 = vpop.permute.xlu2 %302 }
 0x3a9   :  { %v305_v41 = vmul.f32 %v303_v40, %v296_v39 }
 0x3ab   :  { %307 = vrot.lane.b32.xlu2 %v305_v41, %s966_s2 }
 0x405   :  { %v308_v44 = vpop.permute.xlu2 %307 }
 0x406   :  { %v310_v45 = vadd.f32 %v308_v44, %v300_v43 }
 0x408   :  { %833 = vtanh.f32 %v310_v45  ;;  %v369_v5 = vrot.slane %v310_v45, 7 }
 0x40e   :  { %v834_v46 = vpop.eup %833 }
 0x40f   :  { %313 = vrot.lane.b32.xlu0 %v834_v46, %s965_s0 }
 0x481   :  { %v314_v47 = vpop.permute.xlu0 %313 }
 0x482   :  { %v316_v48 = vmul.f32 %v314_v47, %v296_v39 }
 0x484   :  { %v318_v49 = vrot.slane %v316_v48, 1  ;;  %v744_v12 = vsel %vm743_vm3, %v1041_v17, %v316_v48 }
 0x486   :  { %319 = vrot.lane.b32.xlu1 %v318_v49, %s966_s2 }
 0x4f8   :  { %v320_v50 = vpop.permute.xlu1 %319 }
 0x4f9   :  { %796 = vmatmul.msk.f32.vlgmr.msrb.gmra.mxu2 %vm184_vm9, %v320_v50 }
 0x4fa   :  { %619 = vmatpush.msrb.mxu2 %v997_v15 }
 0x4fc   :  { %620 = vmatpush.msrb.mxu2 %v1000_v19 }
 0x4fe   :  { %621 = vmatpush.msrb.mxu2 %v1003_v22 }
 0x500   :  { %622 = vmatpush.msrb.mxu2 %v1005_v24 }
 0x57c   :  { %v340_v51 = vpop.f32.mrf.mxu2 }
 0x57d   :  { %v344_v52 = vrot.slane %v340_v51, 6 }
 0x57f   :  { %v346_v54 = vadd.f32 %v344_v52, %v1029_v53 }
 0x581   :  { %v797_v55 = vmul.f32 -1.442695, %v346_v54 }
 0x583   :  { %835 = vpow2.f32 %v797_v55 }
 0x589   :  { %v836_v56 = vpop.eup %835 }
 0x58a   :  { %v351_v57 = vadd.f32 1.0, %v836_v56 }
 0x58c   :  { %837 = vrcp.f32 %v351_v57  ;;  %v363_v15 = vand.u32 2147483648, %v351_v57  ;;  %v361_v19 = vand.u32 2147483647, %v351_v57  ;;  %vm357_vm15 = vweird.f32 %v351_v57 }
 0x58d   :  { %839 = vtanh.f32 %v346_v54 }
 0x58e   :  { %v364_v24 = vor.u32 1.1754944e-38, %v363_v15  ;;  %vm362_vm2 = vcmp.eq.f32.partialorder %v361_v19, 8.507059e+37 }
 0x592   :  { %v838_v58 = vpop.eup %837 }
 0x593   :  { %v353_v59 = vmul.f32 %v838_v58, %v351_v57  ;;  %vm358_vm14 = vweird.f32 %v838_v58  ;;  %v840_v63 = vpop.eup %839 }
 0x594   :  { %vm359_vm1 = vmor %vm357_vm15, %vm358_vm14 }
 0x595   :  { %v354_v60 = vsub.f32 1.0, %v353_v59 }
 0x597   :  { %v355_v61 = vmul.f32 %v838_v58, %v354_v60 }
 0x599   :  { %v356_v22 = vadd.f32 %v838_v58, %v355_v61 }
 0x59b   :  { %v360_v62 = vsel %vm359_vm1, %v838_v58, %v356_v22 }
 0x59c   :  { %v365_v0 = vsel %vm362_vm2, %v364_v24, %v360_v62 }
 0x59d   :  { %v367_v1 = vsel %vm1032_vm5, %v840_v63, %v365_v0 }
 0x59e   :  { %373 = vrot.lane.b32.xlu2 %v367_v1, %s965_s0  ;;  %v371_v6 = vmul.f32 %v369_v5, %v367_v1 }
 0x5f8   :  { %v374_v3 = vpop.permute.xlu2 %373 }
 0x5f9   :  { %v376_v4 = vmul.f32 %v374_v3, %v367_v1 }
 0x5fb   :  { %378 = vrot.lane.b32.xlu0 %v376_v4, %s966_s2 }
 0x66d   :  { %v379_v7 = vpop.permute.xlu0 %378 }
 0x66e   :  { %v381_v8 = vadd.f32 %v379_v7, %v371_v6 }
 0x670   :  { %841 = vtanh.f32 %v381_v8  ;;  %v440_v40 = vrot.slane %v381_v8, 7 }
 0x676   :  { %v842_v9 = vpop.eup %841 }
 0x677   :  { %384 = vrot.lane.b32.xlu1 %v842_v9, %s965_s0 }
 0x6e9   :  { %v385_v10 = vpop.permute.xlu1 %384 }
 0x6ea   :  { %v387_v11 = vmul.f32 %v385_v10, %v367_v1 }
 0x6ec   :  { %v389_v13 = vrot.slane %v387_v11, 2  ;;  %v746_v14 = vsel %vm745_vm4, %v744_v12, %v387_v11  ;;  %vm750_vm4 = vcmask 1044480  }
 0x6ee   :  { %390 = vrot.lane.b32.xlu2 %v389_v13, %s966_s2 }
 0x748   :  { %v391_v16 = vpop.permute.xlu2 %390 }
 0x749   :  { %798 = vmatmul.msk.f32.vlgmr.msra.gmra.mxu3 %vm184_vm9, %v391_v16 }
 0x7cc   :  { %v411_v18 = vpop.f32.mrf.mxu3 }
 0x7cd   :  { %v415_v20 = vrot.slane %v411_v18, 5 }
 0x7cf   :  { %v417_v21 = vadd.f32 %v415_v20, %v1029_v53 }
 0x7d1   :  { %v799_v23 = vmul.f32 -1.442695, %v417_v21 }
 0x7d3   :  { %843 = vpow2.f32 %v799_v23 }
 0x7d9   :  { %v844_v25 = vpop.eup %843 }
 0x7da   :  { %v422_v26 = vadd.f32 1.0, %v844_v25 }
 0x7dc   :  { %845 = vrcp.f32 %v422_v26  ;;  %v434_v17 = vand.u32 2147483648, %v422_v26  ;;  %v432_v31 = vand.u32 2147483647, %v422_v26  ;;  %vm428_vm7 = vweird.f32 %v422_v26 }
 0x7dd   :  { %847 = vtanh.f32 %v417_v21 }
 0x7de   :  { %v435_v33 = vor.u32 1.1754944e-38, %v434_v17  ;;  %vm433_vm10 = vcmp.eq.f32.partialorder %v432_v31, 8.507059e+37 }
 0x7e2   :  { %v846_v27 = vpop.eup %845 }
 0x7e3   :  { %v424_v28 = vmul.f32 %v846_v27, %v422_v26  ;;  %vm429_vm6 = vweird.f32 %v846_v27  ;;  %v848_v35 = vpop.eup %847 }
 0x7e4   :  { %vm430_vm8 = vmor %vm428_vm7, %vm429_vm6 }
 0x7e5   :  { %v425_v29 = vsub.f32 1.0, %v424_v28 }
 0x7e7   :  { %v426_v30 = vmul.f32 %v846_v27, %v425_v29 }
 0x7e9   :  { %v427_v32 = vadd.f32 %v846_v27, %v426_v30 }
 0x7eb   :  { %v431_v34 = vsel %vm430_vm8, %v846_v27, %v427_v32 }
 0x7ec   :  { %v436_v36 = vsel %vm433_vm10, %v435_v33, %v431_v34 }
 0x7ed   :  { %v438_v37 = vsel %vm1032_vm5, %v848_v35, %v436_v36 }
 0x7ee   :  { %444 = vrot.lane.b32.xlu0 %v438_v37, %s965_s0  ;;  %v442_v41 = vmul.f32 %v440_v40, %v438_v37 }
 0x860   :  { %v445_v38 = vpop.permute.xlu0 %444 }
 0x861   :  { %v447_v39 = vmul.f32 %v445_v38, %v438_v37 }
 0x863   :  { %449 = vrot.lane.b32.xlu1 %v447_v39, %s966_s2 }
 0x8d5   :  { %v450_v42 = vpop.permute.xlu1 %449 }
 0x8d6   :  { %v452_v43 = vadd.f32 %v450_v42, %v442_v41 }
 0x8d8   :  { %849 = vtanh.f32 %v452_v43  ;;  %v511_v4 = vrot.slane %v452_v43, 7 }
 0x8de   :  { %v850_v44 = vpop.eup %849 }
 0x8df   :  { %455 = vrot.lane.b32.xlu2 %v850_v44, %s965_s0 }
 0x939   :  { %v456_v45 = vpop.permute.xlu2 %455 }
 0x93a   :  { %v458_v46 = vmul.f32 %v456_v45, %v438_v37 }
 0x93c   :  { %v460_v47 = vrot.slane %v458_v46, 3  ;;  %v748_v48 = vsel %vm747_vm11, %v746_v14, %v458_v46  ;;  %vm752_vm11 = vcmask 1045504  }
 0x93e   :  { %461 = vrot.lane.b32.xlu0 %v460_v47, %s966_s2 }
 0x9b0   :  { %v462_v49 = vpop.permute.xlu0 %461 }
 0x9b1   :  { %800 = vmatmul.msk.f32.vlgmr.msra.gmra.mxu2 %vm184_vm9, %v462_v49 }
 0xa34   :  { %v482_v50 = vpop.f32.mrf.mxu2 }
 0xa35   :  { %v486_v51 = vrot.slane %v482_v50, 4 }
 0xa37   :  { %v488_v52 = vadd.f32 %v486_v51, %v1029_v53 }
 0xa39   :  { %v801_v54 = vmul.f32 -1.442695, %v488_v52 }
 0xa3b   :  { %851 = vpow2.f32 %v801_v54 }
 0xa41   :  { %v852_v55 = vpop.eup %851 }
 0xa42   :  { %v493_v56 = vadd.f32 1.0, %v852_v55 }
 0xa44   :  { %853 = vrcp.f32 %v493_v56  ;;  %v505_v60 = vand.u32 2147483648, %v493_v56  ;;  %v503_v61 = vand.u32 2147483647, %v493_v56  ;;  %vm499_vm13 = vweird.f32 %v493_v56 }
 0xa45   :  { %855 = vtanh.f32 %v488_v52 }
 0xa46   :  { %v506_v22 = vor.u32 1.1754944e-38, %v505_v60  ;;  %vm504_vm15 = vcmp.eq.f32.partialorder %v503_v61, 8.507059e+37 }
 0xa4a   :  { %v854_v57 = vpop.eup %853 }
 0xa4b   :  { %v495_v58 = vmul.f32 %v854_v57, %v493_v56  ;;  %vm500_vm12 = vweird.f32 %v854_v57  ;;  %v856_v62 = vpop.eup %855 }
 0xa4c   :  { %vm501_vm14 = vmor %vm499_vm13, %vm500_vm12 }
 0xa4d   :  { %v496_v59 = vsub.f32 1.0, %v495_v58 }
 0xa4f   :  { %v497_v15 = vmul.f32 %v854_v57, %v496_v59 }
 0xa51   :  { %v498_v19 = vadd.f32 %v854_v57, %v497_v15 }
 0xa53   :  { %v502_v24 = vsel %vm501_vm14, %v854_v57, %v498_v19 }
 0xa54   :  { %v507_v63 = vsel %vm504_vm15, %v506_v22, %v502_v24 }
 0xa55   :  { %v509_v0 = vsel %vm1032_vm5, %v856_v62, %v507_v63 }
 0xa56   :  { %515 = vrot.lane.b32.xlu1 %v509_v0, %s965_s0  ;;  %v513_v5 = vmul.f32 %v511_v4, %v509_v0 }
 0xac8   :  { %v516_v1 = vpop.permute.xlu1 %515 }
 0xac9   :  { %v518_v3 = vmul.f32 %v516_v1, %v509_v0 }
 0xacb   :  { %520 = vrot.lane.b32.xlu2 %v518_v3, %s966_s2 }
 0xb25   :  { %v521_v6 = vpop.permute.xlu2 %520 }
 0xb26   :  { %v523_v7 = vadd.f32 %v521_v6, %v513_v5 }
 0xb28   :  { %857 = vtanh.f32 %v523_v7  ;;  %v582_v38 = vrot.slane %v523_v7, 7 }
 0xb2e   :  { %v858_v8 = vpop.eup %857 }
 0xb2f   :  { %526 = vrot.lane.b32.xlu0 %v858_v8, %s965_s0 }
 0xba1   :  { %v527_v9 = vpop.permute.xlu0 %526 }
 0xba2   :  { %v529_v10 = vmul.f32 %v527_v9, %v509_v0 }
 0xba4   :  { %v531_v11 = vrot.slane %v529_v10, 4  ;;  %v749_v12 = vsel %vm115_vm0, %v748_v48, %v529_v10 }
 0xba6   :  { %532 = vrot.lane.b32.xlu1 %v531_v11, %s966_s2 }
 0xc18   :  { %v533_v13 = vpop.permute.xlu1 %532 }
 0xc19   :  { %802 = vmatmul.msk.f32.vlgmr.msrb.gmra.mxu3 %vm184_vm9, %v533_v13 }
 0xc9c   :  { %v553_v14 = vpop.f32.mrf.mxu3 }
 0xc9d   :  { %v557_v16 = vrot.slane %v553_v14, 3 }
 0xc9f   :  { %v559_v18 = vadd.f32 %v557_v16, %v1029_v53 }
 0xca1   :  { %v803_v20 = vmul.f32 -1.442695, %v559_v18 }
 0xca3   :  { %859 = vpow2.f32 %v803_v20 }
 0xca9   :  { %v860_v21 = vpop.eup %859 }
 0xcaa   :  { %v564_v23 = vadd.f32 1.0, %v860_v21 }
 0xcac   :  { %861 = vrcp.f32 %v564_v23  ;;  %v576_v28 = vand.u32 2147483648, %v564_v23  ;;  %v574_v17 = vand.u32 2147483647, %v564_v23  ;;  %vm570_vm1 = vweird.f32 %v564_v23 }
 0xcad   :  { %863 = vtanh.f32 %v559_v18 }
 0xcae   :  { %v577_v31 = vor.u32 1.1754944e-38, %v576_v28  ;;  %vm575_vm3 = vcmp.eq.f32.partialorder %v574_v17, 8.507059e+37 }
 0xcb2   :  { %v862_v25 = vpop.eup %861 }
 0xcb3   :  { %v566_v26 = vmul.f32 %v862_v25, %v564_v23  ;;  %vm571_vm0 = vweird.f32 %v862_v25  ;;  %v864_v33 = vpop.eup %863 }
 0xcb4   :  { %vm572_vm2 = vmor %vm570_vm1, %vm571_vm0  ;;  %vm783_vm0 = vcmask 15360  }
 0xcb5   :  { %v567_v27 = vsub.f32 1.0, %v566_v26 }
 0xcb7   :  { %v568_v29 = vmul.f32 %v862_v25, %v567_v27 }
 0xcb9   :  { %v569_v30 = vadd.f32 %v862_v25, %v568_v29 }
 0xcbb   :  { %v573_v32 = vsel %vm572_vm2, %v862_v25, %v569_v30 }
 0xcbc   :  { %v578_v34 = vsel %vm575_vm3, %v577_v31, %v573_v32 }
 0xcbd   :  { %v580_v35 = vsel %vm1032_vm5, %v864_v33, %v578_v34 }
 0xcbe   :  { %586 = vrot.lane.b32.xlu2 %v580_v35, %s965_s0  ;;  %v584_v39 = vmul.f32 %v582_v38, %v580_v35 }
 0xd18   :  { %v587_v36 = vpop.permute.xlu2 %586 }
 0xd19   :  { %v589_v37 = vmul.f32 %v587_v36, %v580_v35 }
 0xd1b   :  { %591 = vrot.lane.b32.xlu0 %v589_v37, %s966_s2 }
 0xd8d   :  { %v592_v40 = vpop.permute.xlu0 %591 }
 0xd8e   :  { %v594_v41 = vadd.f32 %v592_v40, %v584_v39  ;;  %v67_v40 = vld [vmem:[#allocation6 + $0x40] sm:$0xff] }
 0xd8f   :  { %774 = vmatpush.msrb.mxu1 %v67_v40 }
 0xd90   :  { %865 = vtanh.f32 %v594_v41  ;;  %v653_v1 = vrot.slane %v594_v41, 7  ;;  %v66_v41 = vld [vmem:[#allocation6 + $0x38] sm:$0xff] }
 0xd91   :  { %775 = vmatpush.msrb.mxu1 %v66_v41 }
 0xd96   :  { %v866_v42 = vpop.eup %865 }
 0xd97   :  { %597 = vrot.lane.b32.xlu1 %v866_v42, %s965_s0  ;;  %v65_v42 = vld [vmem:[#allocation6 + $0x30] sm:$0xff] }
 0xd98   :  { %776 = vmatpush.msrb.mxu1 %v65_v42 }
 0xd9a   :  { %777 = vmatpush.msrb.mxu1 %v64_v2 }
 0xe09   :  { %v598_v43 = vpop.permute.xlu1 %597 }
 0xe0a   :  { %v600_v44 = vmul.f32 %v598_v43, %v580_v35 }
 0xe0c   :  { %v602_v45 = vrot.slane %v600_v44, 5  ;;  %v751_v46 = vsel %vm750_vm4, %v749_v12, %v600_v44 }
 0xe0e   :  { %603 = vrot.lane.b32.xlu2 %v602_v45, %s966_s2 }
 0xe68   :  { %v604_v47 = vpop.permute.xlu2 %603 }
 0xe69   :  { %804 = vmatmul.msk.f32.vlgmr.msrb.gmra.mxu2 %vm184_vm9, %v604_v47  ;;  %v818_v47 = vld [vmem:[#allocation6 + $0x48] ss:$0 sm:$0xff] }
 0xeec   :  { %v624_v48 = vpop.f32.mrf.mxu2 }
 0xeed   :  { %v628_v49 = vrot.slane %v624_v48, 2 }
 0xeef   :  { %v630_v50 = vadd.f32 %v628_v49, %v1029_v53 }
 0xef1   :  { %v805_v51 = vmul.f32 -1.442695, %v630_v50 }
 0xef3   :  { %867 = vpow2.f32 %v805_v51 }
 0xef9   :  { %v868_v52 = vpop.eup %867 }
 0xefa   :  { %v635_v54 = vadd.f32 1.0, %v868_v52 }
 0xefc   :  { %869 = vrcp.f32 %v635_v54  ;;  %v647_v58 = vand.u32 2147483648, %v635_v54  ;;  %v645_v60 = vand.u32 2147483647, %v635_v54  ;;  %vm641_vm7 = vweird.f32 %v635_v54 }
 0xefd   :  { %871 = vtanh.f32 %v630_v50 }
 0xefe   :  { %v648_v61 = vor.u32 1.1754944e-38, %v647_v58  ;;  %vm646_vm10 = vcmp.eq.f32.partialorder %v645_v60, 8.507059e+37 }
 0xf02   :  { %v870_v55 = vpop.eup %869 }
 0xf03   :  { %v637_v56 = vmul.f32 %v870_v55, %v635_v54  ;;  %vm642_vm6 = vweird.f32 %v870_v55  ;;  %v872_v22 = vpop.eup %871 }
 0xf04   :  { %vm643_vm8 = vmor %vm641_vm7, %vm642_vm6 }
 0xf05   :  { %v638_v57 = vsub.f32 1.0, %v637_v56 }
 0xf07   :  { %v639_v59 = vmul.f32 %v870_v55, %v638_v57 }
 0xf09   :  { %v640_v15 = vadd.f32 %v870_v55, %v639_v59 }
 0xf0b   :  { %v644_v19 = vsel %vm643_vm8, %v870_v55, %v640_v15 }
 0xf0c   :  { %v649_v24 = vsel %vm646_vm10, %v648_v61, %v644_v19 }
 0xf0d   :  { %v651_v62 = vsel %vm1032_vm5, %v872_v22, %v649_v24 }
 0xf0e   :  { %657 = vrot.lane.b32.xlu0 %v651_v62, %s965_s0  ;;  %v655_v3 = vmul.f32 %v653_v1, %v651_v62 }
 0xf80   :  { %v658_v63 = vpop.permute.xlu0 %657 }
 0xf81   :  { %v660_v0 = vmul.f32 %v658_v63, %v651_v62 }
 0xf83   :  { %662 = vrot.lane.b32.xlu1 %v660_v0, %s966_s2 }
 0xff5   :  { %v663_v4 = vpop.permute.xlu1 %662 }
 0xff6   :  { %v665_v5 = vadd.f32 %v663_v4, %v655_v3 }
 0xff8   :  { %873 = vtanh.f32 %v665_v5  ;;  %v724_v35 = vrot.slane %v665_v5, 7 }
 0xffe   :  { %v874_v6 = vpop.eup %873 }
 0xfff   :  { %668 = vrot.lane.b32.xlu2 %v874_v6, %s965_s0 }
0x1059   :  { %v669_v7 = vpop.permute.xlu2 %668 }
0x105a   :  { %v671_v8 = vmul.f32 %v669_v7, %v651_v62 }
0x105c   :  { %v673_v9 = vrot.slane %v671_v8, 6  ;;  %v753_v10 = vsel %vm752_vm11, %v751_v46, %v671_v8 }
0x105e   :  { %674 = vrot.lane.b32.xlu0 %v673_v9, %s966_s2 }
0x10d0   :  { %v675_v11 = vpop.permute.xlu0 %674 }
0x10d1   :  { %806 = vmatmul.msk.f32.vlgmr.msrb.gmra.mxu0 %vm184_vm9, %v675_v11 }
0x114e   :  { %v695_v12 = vpop.f32.mrf.mxu0 }
0x114f   :  { %v699_v13 = vrot.slane %v695_v12, 1 }
0x1151   :  { %v701_v14 = vadd.f32 %v699_v13, %v1029_v53 }
0x1153   :  { %v807_v16 = vmul.f32 -1.442695, %v701_v14 }
0x1155   :  { %875 = vpow2.f32 %v807_v16 }
0x115b   :  { %v876_v18 = vpop.eup %875 }
0x115c   :  { %v706_v20 = vadd.f32 1.0, %v876_v18 }
0x115e   :  { %877 = vrcp.f32 %v706_v20  ;;  %v718_v26 = vand.u32 2147483648, %v706_v20  ;;  %v716_v28 = vand.u32 2147483647, %v706_v20  ;;  %vm712_vm13 = vweird.f32 %v706_v20 }
0x115f   :  { %879 = vtanh.f32 %v701_v14 }
0x1160   :  { %v719_v17 = vor.u32 1.1754944e-38, %v718_v26  ;;  %vm717_vm15 = vcmp.eq.f32.partialorder %v716_v28, 8.507059e+37 }
0x1164   :  { %v878_v21 = vpop.eup %877 }
0x1165   :  { %v708_v23 = vmul.f32 %v878_v21, %v706_v20  ;;  %vm713_vm12 = vweird.f32 %v878_v21  ;;  %v880_v53 = vpop.eup %879 }
0x1166   :  { %vm714_vm14 = vmor %vm712_vm13, %vm713_vm12 }
0x1167   :  { %v709_v25 = vsub.f32 1.0, %v708_v23 }
0x1169   :  { %v710_v27 = vmul.f32 %v878_v21, %v709_v25 }
0x116b   :  { %v711_v29 = vadd.f32 %v878_v21, %v710_v27 }
0x116d   :  { %v715_v30 = vsel %vm714_vm14, %v878_v21, %v711_v29 }
0x116e   :  { %v720_v31 = vsel %vm717_vm15, %v719_v17, %v715_v30 }
0x116f   :  { %v722_v32 = vsel %vm1032_vm5, %v880_v53, %v720_v31  ;;  %vm754_vm5 = vcmask 1046528  }
0x1170   :  { %728 = vrot.lane.b32.xlu1 %v722_v32, %s965_s0  ;;  %v726_v36 = vmul.f32 %v724_v35, %v722_v32 }
0x11e2   :  { %v729_v33 = vpop.permute.xlu1 %728 }
0x11e3   :  { %v731_v34 = vmul.f32 %v729_v33, %v722_v32 }
0x11e5   :  { %733 = vrot.lane.b32.xlu2 %v731_v34, %s966_s2 }
0x123f   :  { %v734_v37 = vpop.permute.xlu2 %733 }
0x1240   :  { %v736_v38 = vadd.f32 %v734_v37, %v726_v36 }
0x1242   :  { %881 = vtanh.f32 %v736_v38 }
0x1248   :  { %v882_v39 = vpop.eup %881 }
0x1249   :  { %739 = vrot.lane.b32.xlu0 %v882_v39, %s965_s0 }
0x12bb   :  { %v740_v43 = vpop.permute.xlu0 %739 }
0x12bc   :  { %v742_v44 = vmul.f32 %v740_v43, %v722_v32 }
0x12be   :  { %v755_v45 = vsel %vm754_vm5, %v753_v10, %v742_v44 }
0x12bf   :  { %758 = vrot.lane.b32.xlu1 %v755_v45, %s966_s2 }
0x1331   :  { %v759_v46 = vpop.permute.xlu1 %758 }
0x1332   :  { %808 = vmatmul.msk.f32.vlgmr.msrb.gmra.mxu1 %vm184_vm9, %v759_v46 }
0x13af   :  { %v779_v48 = vpop.f32.mrf.mxu1 }
0x13b0   :  { %v780_v49 = vadd.f32 %v818_v47, %v779_v48 }
0x13b2   :  { %v782_v50 = vmax.f32 %v780_v49, 0.0 }
0x13b4   :  { %784 = vst.msk [vmem:[%s1118_s3] sm:$0xff] %vm783_vm0, %v782_v50 }
0x13b5   :  { %789 = vsyncpa [#allocation3], 1 }
0x13b6   :  { %790 = vsyncpa [#allocation5], 1 }

</bundles_post_ra>
